<compile_context>
chip_gen: v6e
topology: v6e:2x2x1
jax: 0.10.0
libtpu: 0.0.40
codegen_flags: <defaults>
</compile_context>

<pallas_src>
import functools

import jax
import jax.numpy as jnp
from jax.experimental import pallas as pl
from jax.experimental.pallas import tpu as pltpu


def _round_up(x, m):
    return ((x + m - 1) // m) * m


def _vmem_capacity_bytes():
    """Generation-aware VMEM size; conservative (v7x-sized) fallback."""
    try:
        info = pltpu.get_tpu_info()
        cap = int(getattr(info, "vmem_capacity_bytes", 0) or 0)
        if cap > 0:
            return cap
    except Exception:
        pass
    return 64 * 1024 * 1024


def _aggregator_kernel(nf_ref, w_ref, *rest, aggr_method, num_neighbors,
                       feat_dim, flat_layout, has_bias):
    # flat_layout:  nf_ref is (node_tile, K*D)   (D % 128 == 0)
    # otherwise:    nf_ref is (node_tile, K, D)
    # w_ref:   (D, out_tile)
    # b_ref:   (1, out_tile) f32                 (only if has_bias)
    # out_ref: (node_tile, out_tile)
    if has_bias:
        b_ref, out_ref = rest
    else:
        (out_ref,) = rest
        b_ref = None

    K, D = num_neighbors, feat_dim

    def neighbor(k):
        if flat_layout:
            # static, lane-aligned D-wide slice out of the (nt, K*D) block
            return nf_ref[:, pl.ds(k * D, D)]
        return nf_ref[:, k, :]

    # Unrolled neighbor reduction on (node_tile, D) slices, f32 accumulator
    # (safe on v5e: bf16 never hits the VPU).
    acc = neighbor(0).astype(jnp.float32)
    for k in range(1, K):
        nxt = neighbor(k).astype(jnp.float32)
        if aggr_method == "max":
            acc = jnp.maximum(acc, nxt)
        else:
            acc = acc + nxt
    if aggr_method == "mean":
        acc = acc * (1.0 / K)          # compile-time constant

    w = w_ref[...]
    # Feed the MXU in the weight's native dtype (bf16 stays bf16); f32 acc.
    lhs = acc if w.dtype == jnp.float32 else acc.astype(w.dtype)
    hidden = jnp.dot(lhs, w, preferred_element_type=jnp.float32)
    if has_bias:
        hidden = hidden + b_ref[...]
    out_ref[...] = hidden.astype(out_ref.dtype)


def aggregator_forward(neighbor_feature, weight, bias=None, aggr_method="mean",
                       node_tile=None, out_tile=None,
                       vmem_tile_budget_bytes=None):
    """Pallas implementation of Aggregator.forward.

    neighbor_feature: (N, K, D)
    weight:           (D, O)
    bias:             (O,) or None
    """
    if aggr_method not in ("mean", "sum", "max"):
        raise ValueError(
            "Unknown aggr type, expected sum, max, or mean, but got {}".format(
                aggr_method))

    N, K, D = neighbor_feature.shape
    Dw, O = weight.shape
    assert D == Dw, "weight input_dim must match feature dim"
    out_dtype = neighbor_feature.dtype
    has_bias = bias is not None

    # ---- generation-aware VMEM budget ----
    vmem_cap = _vmem_capacity_bytes()
    if vmem_tile_budget_bytes is None:
        vmem_tile_budget_bytes = int(vmem_cap * 0.70)   # ~45 MiB v7x, ~90 MiB v5e/v6e
    budget = vmem_tile_budget_bytes

    nf_item = jnp.dtype(neighbor_feature.dtype).itemsize
    w_item = jnp.dtype(weight.dtype).itemsize
    out_item = jnp.dtype(out_dtype).itemsize

    def _sublane_pack(itemsize):
        return 8 * max(1, 4 // itemsize)    # 8 f32 / 16 bf16 / 32 int8

    nf_sub = _sublane_pack(nf_item)
    w_sub = _sublane_pack(w_item)
    out_sub = _sublane_pack(out_item)
    D_lane = _round_up(D, 128)

    # Flat (N, K*D) layout avoids sublane-padding the neighbor axis entirely.
    flat_layout = (D % 128 == 0)

    def _tile_bytes(nt, ot):
        """Real VMEM footprint of one grid step (double-buffered + temps)."""
        if flat_layout:
            nf_blk = _round_up(nt, nf_sub) * K * D * nf_item
        else:
            nf_blk = nt * _round_up(K, nf_sub) * D_lane * nf_item
        w_blk = _round_up(D, w_sub) * ot * w_item
        b_blk = (8 * ot * 4) if has_bias else 0
        o_blk = _round_up(nt, out_sub) * ot * out_item
        pipelined = 2 * (nf_blk + w_blk + b_blk + o_blk)
        # f32 accumulator + one streaming operand, plus the f32 matmul result
        temps = 2 * nt * D_lane * 4 + nt * ot * 4
        return pipelined + temps

    # ---- lane-dense output tiling / weight residency ----
    O_pad_base = _round_up(max(O, 128), 128)
    if out_tile is None:
        if 2 * _round_up(D, w_sub) * O_pad_base * w_item <= 8 * 1024 * 1024:
            out_tile = O_pad_base          # weight block fetched once, resident
        else:
            out_tile = min(O_pad_base, 1024)
            if out_tile >= 256:            # MXU-shape hygiene on v6e/v7x
                out_tile = (out_tile // 256) * 256
    else:
        out_tile = min(max(128, _round_up(out_tile, 128)), O_pad_base)
    O_pad = _round_up(O_pad_base, out_tile)

    # Shrink out_tile if even the smallest node tile would blow the budget.
    while _tile_bytes(8, out_tile) > budget and out_tile > 128:
        out_tile = max(128, ((out_tile // 2) // 128) * 128)
        O_pad = _round_up(O_pad_base, out_tile)

    # ---- node tile: largest that fits the (correctly modeled) budget ----
    if node_tile is None:
        node_tile = 8
        for cand in (1024, 768, 512, 384, 256, 128, 64, 32, 16, 8):
            if _tile_bytes(cand, out_tile) <= budget:
                node_tile = cand
                break
    else:
        node_tile = max(8, _round_up(node_tile, 8))
    node_tile = min(node_tile, _round_up(N, 8))   # no point exceeding N

    # ---- pad only the small weight/bias to the lane-dense output width ----
    w_p = weight if O_pad == O else jnp.pad(weight, ((0, 0), (0, O_pad - O)))
    inputs = []
    if flat_layout:
        nf_in = neighbor_feature.reshape(N, K * D)   # contiguous, no HBM copy
        nf_spec = pl.BlockSpec((node_tile, K * D), lambda i, j: (i, 0))
    else:
        nf_in = neighbor_feature
        nf_spec = pl.BlockSpec((node_tile, K, D), lambda i, j: (i, 0, 0))
    inputs.extend([nf_in, w_p])
    in_specs = [nf_spec, pl.BlockSpec((D, out_tile), lambda i, j: (0, j))]
    if has_bias:
        bias2d = jnp.pad(bias.reshape(1, O).astype(jnp.float32),
                         ((0, 0), (0, O_pad - O)))
        inputs.append(bias2d)
        in_specs.append(pl.BlockSpec((1, out_tile), lambda i, j: (0, j)))

    # No input padding along N: ragged last node tile is handled by Pallas
    # partial-block reads and masked output writes.
    grid = (pl.cdiv(N, node_tile), O_pad // out_tile)

    kernel = functools.partial(_aggregator_kernel,
                               aggr_method=aggr_method,
                               num_neighbors=K,
                               feat_dim=D,
                               flat_layout=flat_layout,
                               has_bias=has_bias)

    tile_b = _tile_bytes(node_tile, out_tile)
    vmem_limit = int(min(int(vmem_cap * 0.9),
                         max(32 * 1024 * 1024, int(tile_b * 1.25))))

    out_padded = pl.pallas_call(
        kernel,
        out_shape=jax.ShapeDtypeStruct((N, O_pad), out_dtype),
        grid_spec=pltpu.PrefetchScalarGridSpec(
            num_scalar_prefetch=0,
            grid=grid,
            in_specs=in_specs,
            out_specs=pl.BlockSpec((node_tile, out_tile), lambda i, j: (i, j)),
        ),
        compiler_params=pltpu.CompilerParams(
            # Megacore (v7x) shards along nodes only, so the two cores never
            # stream the same neighbor_feature tiles.
            dimension_semantics=("parallel", "arbitrary"),
            vmem_limit_bytes=vmem_limit),
    )(*inputs)

    return out_padded if O_pad == O else out_padded[:, :O]


def init_aggregator_params(key, input_dim, output_dim, use_bias=False):
    """Deterministic parameter init mimicking kaiming_uniform_ on (in, out)."""
    # PyTorch kaiming_uniform_ (a=0): bound = sqrt(6 / fan_in),
    # fan_in = tensor.size(1) = output_dim for this 2-D parameter.
    bound = (6.0 / output_dim) ** 0.5
    weight = jax.random.uniform(
        key, (input_dim, output_dim), dtype=jnp.float32,
        minval=-bound, maxval=bound)
    bias = jnp.zeros((output_dim,), dtype=jnp.float32) if use_bias else None
    return weight, bias


def aggregator_reference(neighbor_feature, weight, bias=None, aggr_method="mean"):
    if aggr_method == "mean":
        aggr = jnp.mean(neighbor_feature, axis=1)
    elif aggr_method == "sum":
        aggr = jnp.sum(neighbor_feature, axis=1)
    elif aggr_method == "max":
        aggr = jnp.max(neighbor_feature, axis=1)
    else:
        raise ValueError(aggr_method)
    out = aggr @ weight
    if bias is not None:
        out = out + bias
    return out


if __name__ == "__main__":
    key = jax.random.PRNGKey(0)
    k_x, k_w, k_x2, k_w2, k_x4, k_w4 = jax.random.split(key, 6)

    # Case 1: 16 nodes, 4 neighbors, 32-d in/out, mean aggregation with bias.
    num_nodes, num_neighbors = 16, 4
    input_dim, output_dim = 32, 32
    neighbor_feature = jax.random.normal(
        k_x, (num_nodes, num_neighbors, input_dim), dtype=jnp.float32)
    weight, bias = init_aggregator_params(k_w, input_dim, output_dim,
                                          use_bias=True)
    out = jax.block_until_ready(
        aggregator_forward(neighbor_feature, weight, bias, aggr_method="mean"))
    ref = aggregator_reference(neighbor_feature, weight, bias,
                               aggr_method="mean")
    assert out.shape == (num_nodes, output_dim)
    assert jnp.allclose(out, ref, atol=1e-5, rtol=1e-5), "mean mismatch"

    # Case 2: ragged shapes (N not a multiple of any tile, odd dims), max
    # aggregation, no bias — exercises partial-block reads/masked writes and
    # the lane-dense padded-output path without any input HBM pad copy.
    n2, k2, d2, o2 = 13, 3, 20, 17
    nf2 = jax.random.normal(k_x2, (n2, k2, d2), dtype=jnp.float32)
    w2, _ = init_aggregator_params(k_w2, d2, o2, use_bias=False)
    out2 = jax.block_until_ready(
        aggregator_forward(nf2, w2, None, aggr_method="max"))
    ref2 = aggregator_reference(nf2, w2, None, aggr_method="max")
    assert out2.shape == (n2, o2)
    assert jnp.allclose(out2, ref2, atol=1e-5, rtol=1e-5), "max mismatch"

    # Case 3: sum aggregation on case-1 inputs, no bias.
    out3 = jax.block_until_ready(
        aggregator_forward(neighbor_feature, weight, None, aggr_method="sum"))
    ref3 = aggregator_reference(neighbor_feature, weight, None,
                                aggr_method="sum")
    assert jnp.allclose(out3, ref3, atol=1e-5, rtol=1e-5), "sum mismatch"

    # Case 4: D a multiple of 128 — exercises the flat (N, K*D) layout path
    # (no neighbor-axis sublane padding) and the weight-resident path.
    n4, k4, d4, o4 = 10, 3, 128, 256
    nf4 = jax.random.normal(k_x4, (n4, k4, d4), dtype=jnp.float32)
    w4, b4 = init_aggregator_params(k_w4, d4, o4, use_bias=True)
    out4 = jax.block_until_ready(
        aggregator_forward(nf4, w4, b4, aggr_method="mean"))
    ref4 = aggregator_reference(nf4, w4, b4, aggr_method="mean")
    assert out4.shape == (n4, o4)
    assert jnp.allclose(out4, ref4, atol=1e-5, rtol=1e-5), "flat-layout mismatch"

    print("KERNEL_OK")
</pallas_src>

<mosaic_0001>
module attributes {stable_mosaic.version = 11 : i64} {
  func.func @_aggregator_kernel(%arg0: i32, %arg1: i32, %arg2: memref<16x4x32xf32, #tpu.memory_space<vmem>>, %arg3: memref<32x128xf32, #tpu.memory_space<vmem>>, %arg4: memref<1x128xf32, #tpu.memory_space<vmem>>, %arg5: memref<16x128xf32, #tpu.memory_space<vmem>>) attributes {dimension_semantics = [#tpu.dimension_semantics<parallel>, #tpu.dimension_semantics<arbitrary>], iteration_bounds = array<i64: 1, 1>, scalar_prefetch = 0 : i64, scratch_operands = 0 : i64, tpu.core_type = #tpu.core_type<tc>, window_params = [{transform_indices = @transform_0, window_bounds = array<i64: 16, 4, 32>}, {transform_indices = @transform_1, window_bounds = array<i64: 32, 128>}, {transform_indices = @transform_2, window_bounds = array<i64: 1, 128>}, {transform_indices = @transform_3, window_bounds = array<i64: 16, 128>}]} {
    %c0 = arith.constant 0 : index
    %c0_0 = arith.constant 0 : index
    %c0_1 = arith.constant 0 : index
    %0 = vector.load %arg2[%c0, %c0_0, %c0_1] : memref<16x4x32xf32, #tpu.memory_space<vmem>>, vector<16x1x32xf32>
    %1 = vector.shape_cast %0 : vector<16x1x32xf32> to vector<16x32xf32>
    %c0_2 = arith.constant 0 : index
    %c1 = arith.constant 1 : index
    %c0_3 = arith.constant 0 : index
    %2 = vector.load %arg2[%c0_2, %c1, %c0_3] : memref<16x4x32xf32, #tpu.memory_space<vmem>>, vector<16x1x32xf32>
    %3 = vector.shape_cast %2 : vector<16x1x32xf32> to vector<16x32xf32>
    %4 = arith.addf %1, %3 : vector<16x32xf32>
    %c0_4 = arith.constant 0 : index
    %c2 = arith.constant 2 : index
    %c0_5 = arith.constant 0 : index
    %5 = vector.load %arg2[%c0_4, %c2, %c0_5] : memref<16x4x32xf32, #tpu.memory_space<vmem>>, vector<16x1x32xf32>
    %6 = vector.shape_cast %5 : vector<16x1x32xf32> to vector<16x32xf32>
    %7 = arith.addf %4, %6 : vector<16x32xf32>
    %c0_6 = arith.constant 0 : index
    %c3 = arith.constant 3 : index
    %c0_7 = arith.constant 0 : index
    %8 = vector.load %arg2[%c0_6, %c3, %c0_7] : memref<16x4x32xf32, #tpu.memory_space<vmem>>, vector<16x1x32xf32>
    %9 = vector.shape_cast %8 : vector<16x1x32xf32> to vector<16x32xf32>
    %10 = arith.addf %7, %9 : vector<16x32xf32>
    %cst = arith.constant 2.500000e-01 : f32
    %11 = vector.broadcast %cst : f32 to vector<16x32xf32>
    %12 = arith.mulf %10, %11 : vector<16x32xf32>
    %c0_8 = arith.constant 0 : index
    %c0_9 = arith.constant 0 : index
    %13 = vector.load %arg3[%c0_8, %c0_9] : memref<32x128xf32, #tpu.memory_space<vmem>>, vector<32x128xf32>
    %cst_10 = arith.constant dense<0.000000e+00> : vector<16x128xf32>
    %14 = tpu.matmul %12, %13, %cst_10 {dimension_numbers = #tpu.dot_dimension_numbers<[1], [0], [0], [1], [0, 0, 1, 1], [], []>} : vector<16x32xf32>, vector<32x128xf32>, vector<16x128xf32> -> vector<16x128xf32>
    %c0_11 = arith.constant 0 : index
    %c0_12 = arith.constant 0 : index
    %15 = vector.load %arg4[%c0_11, %c0_12] : memref<1x128xf32, #tpu.memory_space<vmem>>, vector<1x128xf32>
    %16 = vector.broadcast %15 : vector<1x128xf32> to vector<16x128xf32>
    %17 = arith.addf %14, %16 : vector<16x128xf32>
    %c0_13 = arith.constant 0 : index
    %c0_14 = arith.constant 0 : index
    %18 = vector.load %arg5[%c0_13, %c0_14] : memref<16x128xf32, #tpu.memory_space<vmem>>, vector<16x128xf32>
    tpu.vector_store %arg5[%c0_13, %c0_14], %17 {strides = array<i32>} : memref<16x128xf32, #tpu.memory_space<vmem>>, vector<16x128xf32>,
    return
  }
  func.func @transform_0(%arg0: i32, %arg1: i32) -> (i32, i32, i32) {
    %c0_i32 = arith.constant 0 : i32
    %c0_i32_0 = arith.constant 0 : i32
    %c0_i32_1 = arith.constant 0 : i32
    return %arg0, %c0_i32, %c0_i32_0 : i32, i32, i32
  }
  func.func @transform_1(%arg0: i32, %arg1: i32) -> (i32, i32) {
    %c0_i32 = arith.constant 0 : i32
    %c0_i32_0 = arith.constant 0 : i32
    return %c0_i32, %arg1 : i32, i32
  }
  func.func @transform_2(%arg0: i32, %arg1: i32) -> (i32, i32) {
    %c0_i32 = arith.constant 0 : i32
    %c0_i32_0 = arith.constant 0 : i32
    return %c0_i32, %arg1 : i32, i32
  }
  func.func @transform_3(%arg0: i32, %arg1: i32) -> (i32, i32) {
    %c0_i32 = arith.constant 0 : i32
    return %arg0, %arg1 : i32, i32
  }
}

</mosaic_0001>

<bundles_post_ra>
// kernel: tpu_custom_call.1
= control target key start
LH: loop header
LB: loop body
LE: loop exit
PB: predicated region body
PF: predicated region fallthrough
CT: control target
= control target key end

     0   :  { %8 = vsyncpa [#allocation3], 0  ;;  %s487_s0 = inlined_call_operand.hbm [shape: f32[16,4,32], index: 0, kind: input, shape index: {}]   ;;  %s488_s1 = inlined_call_operand.hbm [shape: f32[32,128], index: 1, kind: input, shape index: {}]   ;;  %s489_s2 = inlined_call_operand.vmem [shape: f32[1,128], index: 2, kind: input, shape index: {}]   ;;  %s490_s3 = inlined_call_operand.hbm [shape: f32[16,128], index: 3, kind: output, shape index: {}]  }
   0x1   :  { %9 = vsyncpa [#allocation6], 0 }
   0x2   :  { %10 = vsyncpa [#allocation4], 0  ;;  %s426_s12 = smov [#allocation2]  }
   0x3   :  { %s16_s13 = sshll.u32 %s426_s12, 4  ;;  %s17_s13 = int_to_ptr.vmem [resolvable:$true] %s16_s13 }
   0x4   :  { %s368_s14 = scalar_lea.vmem %s17_s13, 1024  ;;  %p373_p1 = scmp.lt.s32.totalorder %s17_s13, %s17_s13 }
   0x5   :  { %p369_p0 = scmp.ne.s32.totalorder %s17_s13, %s368_s14  ;;  %p374_p2 = scmp.lt.s32.totalorder %s368_s14, %s368_s14 }
   0x7   :  { %p375_p3 = por %p374_p2, %p373_p1 }
   0x9   :  { %p376_p4 = pnand %p375_p3, %p369_p0 }
   0xb   :  { %379 = shalt.err (!%p376_p4)
}
   0xc   :  { %s427_s15 = smov 64   ;;  %s428_s16 = smov 4  }
   0xd   :  { %22 = dma.hbm_to_vmem [thread:$0]  %s487_s0, 1024, %s17_s13, [#allocation3], %s427_s15, %s427_s15, %s428_s16  }
   0xe   :  { %s429_s19 = smov [#allocation5]  }
   0xf   :  { %s28_s20 = sshll.u32 %s429_s19, 4  ;;  %s29_s20 = int_to_ptr.vmem [resolvable:$true] %s28_s20 }
  0x10   :  { %s388_s21 = scalar_lea.vmem %s29_s20, 512  ;;  %p393_p6 = scmp.lt.s32.totalorder %s29_s20, %s29_s20 }
  0x11   :  { %p389_p5 = scmp.ne.s32.totalorder %s29_s20, %s388_s21  ;;  %p394_p7 = scmp.lt.s32.totalorder %s388_s21, %s388_s21 }
  0x13   :  { %p395_p8 = por %p394_p7, %p393_p6 }
  0x15   :  { %p396_p9 = pnand %p395_p8, %p389_p5 }
  0x17   :  { %399 = shalt.err (!%p396_p9)
}
  0x18   :  { %s430_s22 = smov 128   ;;  %s431_s23 = smov 8  }
  0x19   :  { %34 = dma.hbm_to_vmem [thread:$0]  %s488_s1, 512, %s29_s20, [#allocation6], %s430_s22, %s430_s22, %s431_s23  }
  0x1a   :  { %420 = dma.done.wait [#allocation3], 1024  }
  0x1b   :  { %421 = vsyncadd [#allocation3], 4294966272 }
  0x1c   :  { %422 = dma.done.wait [#allocation6], 512  }
  0x1d   :  { %423 = vsyncadd [#allocation6], 4294966784  ;;  %v174_v0 = vld [vmem:[#allocation5 + $0x18] sm:$0xff]  ;;  %v173_v1 = vld [vmem:[#allocation5 + $0x10] sm:$0xff]  ;;  %vm199_vm0 = vcmask 1041409   ;;  %vm202_vm1 = vcmask 1042434  }
  0x1e   :  { %342 = vmatprep.subr.mxu0 %v174_v0  ;;  %v172_v2 = vld [vmem:[#allocation5 + $0x8] sm:$0xff]  ;;  %v43_v3 = vld [vmem:[#allocation2] sm:$0x1]  ;;  %v44_v4 = vld [vmem:[#allocation2 + $0x4] sm:$0x1]  ;;  %vm205_vm2 = vcmask 1043459  }
  0x1f   :  { %343 = vmatpush3.msra.mxu0 %v174_v0  ;;  %v171_v5 = vld [vmem:[#allocation5] sm:$0xff]  ;;  %v45_v6 = vld [vmem:[#allocation2 + $0x8] sm:$0x1]  ;;  %v46_v7 = vld [vmem:[#allocation2 + $0xc] sm:$0x1]  ;;  %vm208_vm3 = vcmask 1044484  }
  0x20   :  { %v47_v8 = vld [vmem:[#allocation2 + $0x10] sm:$0x1]  ;;  %344 = vmatprep.subr.mxu0 %v173_v1  ;;  %v48_v9 = vld [vmem:[#allocation2 + $0x14] sm:$0x1]  ;;  %v49_v10 = vld [vmem:[#allocation2 + $0x18] sm:$0x1] }
  0x21   :  { %v50_v11 = vld [vmem:[#allocation2 + $0x1c] sm:$0x1]  ;;  %345 = vmatpush3.msra.mxu0 %v173_v1  ;;  %v59_v12 = vld [vmem:[#allocation2 + $0x1] sm:$0x1]  ;;  %v60_v13 = vld [vmem:[#allocation2 + $0x5] sm:$0x1] }
  0x22   :  { %v61_v14 = vld [vmem:[#allocation2 + $0x9] sm:$0x1]  ;;  %346 = vmatprep.subr.mxu0 %v172_v2  ;;  %v62_v15 = vld [vmem:[#allocation2 + $0xd] sm:$0x1]  ;;  %v63_v16 = vld [vmem:[#allocation2 + $0x11] sm:$0x1]  ;;  %v75_v18 = vadd.f32 %v59_v12, %v43_v3  ;;  %v76_v19 = vadd.f32 %v60_v13, %v44_v4 }
  0x23   :  { %v64_v17 = vld [vmem:[#allocation2 + $0x15] sm:$0x1]  ;;  %v77_v20 = vadd.f32 %v61_v14, %v45_v6  ;;  %347 = vmatpush3.msra.mxu0 %v172_v2  ;;  %v65_v21 = vld [vmem:[#allocation2 + $0x19] sm:$0x1]  ;;  %v66_v22 = vld [vmem:[#allocation2 + $0x1d] sm:$0x1]  ;;  %v78_v23 = vadd.f32 %v62_v15, %v46_v7  ;;  %v79_v24 = vadd.f32 %v63_v16, %v47_v8 }
  0x24   :  { %v80_v25 = vadd.f32 %v64_v17, %v48_v9  ;;  %v91_v26 = vld [vmem:[#allocation2 + $0x2] sm:$0x1]  ;;  %348 = vmatprep.subr.mxu0 %v171_v5  ;;  %v81_v27 = vadd.f32 %v65_v21, %v49_v10  ;;  %v82_v28 = vadd.f32 %v66_v22, %v50_v11  ;;  %v92_v29 = vld [vmem:[#allocation2 + $0x6] sm:$0x1]  ;;  %v93_v30 = vld [vmem:[#allocation2 + $0xa] sm:$0x1] }
  0x25   :  { %v94_v31 = vld [vmem:[#allocation2 + $0xe] sm:$0x1]  ;;  %v107_v32 = vadd.f32 %v91_v26, %v75_v18  ;;  %349 = vmatpush3.msra.mxu0 %v171_v5  ;;  %v95_v33 = vld [vmem:[#allocation2 + $0x12] sm:$0x1]  ;;  %v96_v34 = vld [vmem:[#allocation2 + $0x16] sm:$0x1]  ;;  %v108_v36 = vadd.f32 %v92_v29, %v76_v19  ;;  %v109_v37 = vadd.f32 %v93_v30, %v77_v20 }
  0x26   :  { %v97_v35 = vld [vmem:[#allocation2 + $0x1a] sm:$0x1]  ;;  %v110_v38 = vadd.f32 %v94_v31, %v78_v23  ;;  %v98_v39 = vld [vmem:[#allocation2 + $0x1e] sm:$0x1]  ;;  %v111_v40 = vadd.f32 %v95_v33, %v79_v24  ;;  %v112_v41 = vadd.f32 %v96_v34, %v80_v25  ;;  %v123_v43 = vld [vmem:[#allocation2 + $0x3] sm:$0x1] }
  0x27   :  { %v113_v42 = vadd.f32 %v97_v35, %v81_v27  ;;  %v124_v44 = vld [vmem:[#allocation2 + $0x7] sm:$0x1]  ;;  %v114_v45 = vadd.f32 %v98_v39, %v82_v28  ;;  %v125_v46 = vld [vmem:[#allocation2 + $0xb] sm:$0x1]  ;;  %v126_v47 = vld [vmem:[#allocation2 + $0xf] sm:$0x1]  ;;  %v139_v49 = vadd.f32 %v123_v43, %v107_v32 }
  0x28   :  { %v127_v48 = vld [vmem:[#allocation2 + $0x13] sm:$0x1]  ;;  %v140_v50 = vadd.f32 %v124_v44, %v108_v36  ;;  %vm211_vm4 = vcmask 1045509   ;;  %v128_v51 = vld [vmem:[#allocation2 + $0x17] sm:$0x1]  ;;  %v141_v54 = vadd.f32 %v125_v46, %v109_v37  ;;  %v142_v55 = vadd.f32 %v126_v47, %v110_v38  ;;  %s432_s26 = smov [#allocation7]  }
  0x29   :  { %v129_v52 = vld [vmem:[#allocation2 + $0x1b] sm:$0x1]  ;;  %v130_v53 = vld [vmem:[#allocation2 + $0x1f] sm:$0x1]  ;;  %v143_v56 = vadd.f32 %v127_v48, %v111_v40  ;;  %vm214_vm5 = vcmask 1046534   ;;  %v144_v57 = vadd.f32 %v128_v51, %v112_v41  ;;  %v155_v60 = vmul.f32 0.25, %v139_v49 }
  0x2a   :  { %v145_v58 = vadd.f32 %v129_v52, %v113_v42  ;;  %v146_v59 = vadd.f32 %v130_v53, %v114_v45  ;;  %v156_v61 = vmul.f32 0.25, %v140_v50  ;;  %v157_v62 = vmul.f32 0.25, %v141_v54  ;;  %v51_v1 = vld [vmem:[#allocation2 + $0x20] sm:$0x1]  ;;  %v52_v5 = vld [vmem:[#allocation2 + $0x24] sm:$0x1] }
  0x2b   :  { %v158_v63 = vmul.f32 0.25, %v142_v55  ;;  %v159_v0 = vmul.f32 0.25, %v143_v56  ;;  %v160_v2 = vmul.f32 0.25, %v144_v57  ;;  %vm217_vm6 = vcmask 1047559   ;;  %v53_v6 = vld [vmem:[#allocation2 + $0x28] sm:$0x1] }
  0x2c   :  { %v161_v3 = vmul.f32 0.25, %v145_v58  ;;  %v162_v4 = vmul.f32 0.25, %v146_v59  ;;  %v54_v7 = vld [vmem:[#allocation2 + $0x2c] sm:$0x1]  ;;  %v198_v8 = vrot.slane %v156_v61, 7  ;;  %v201_v9 = vrot.slane %v157_v62, 6 }
  0x2d   :  { %v204_v10 = vrot.slane %v158_v63, 5  ;;  %vm233_vm7 = vcmask 261120   ;;  %v55_v11 = vld [vmem:[#allocation2 + $0x30] sm:$0x1]  ;;  %v207_v12 = vrot.slane %v159_v0, 4  ;;  %v210_v13 = vrot.slane %v160_v2, 3 }
  0x2e   :  { %v213_v14 = vrot.slane %v161_v3, 2  ;;  %v216_v15 = vrot.slane %v162_v4, 1  ;;  %v56_v16 = vld [vmem:[#allocation2 + $0x34] sm:$0x1]  ;;  %v200_v17 = vsel %vm199_vm0, %v198_v8, %v155_v60  ;;  %v57_v18 = vld [vmem:[#allocation2 + $0x38] sm:$0x1] }
  0x2f   :  { %v58_v19 = vld [vmem:[#allocation2 + $0x3c] sm:$0x1]  ;;  %v67_v20 = vld [vmem:[#allocation2 + $0x21] sm:$0x1]  ;;  %v203_v21 = vsel %vm202_vm1, %v201_v9, %v200_v17  ;;  %v68_v22 = vld [vmem:[#allocation2 + $0x25] sm:$0x1] }
  0x30   :  { %v69_v23 = vld [vmem:[#allocation2 + $0x29] sm:$0x1]  ;;  %v70_v24 = vld [vmem:[#allocation2 + $0x2d] sm:$0x1]  ;;  %v83_v25 = vadd.f32 %v67_v20, %v51_v1  ;;  %v206_v26 = vsel %vm205_vm2, %v204_v10, %v203_v21  ;;  %v71_v27 = vld [vmem:[#allocation2 + $0x31] sm:$0x1]  ;;  %v84_v30 = vadd.f32 %v68_v22, %v52_v5 }
  0x31   :  { %v72_v28 = vld [vmem:[#allocation2 + $0x35] sm:$0x1]  ;;  %v73_v29 = vld [vmem:[#allocation2 + $0x39] sm:$0x1]  ;;  %v85_v31 = vadd.f32 %v69_v23, %v53_v6  ;;  %v86_v32 = vadd.f32 %v70_v24, %v54_v7  ;;  %v209_v33 = vsel %vm208_vm3, %v207_v12, %v206_v26  ;;  %v74_v34 = vld [vmem:[#allocation2 + $0x3d] sm:$0x1]  ;;  %v87_v35 = vadd.f32 %v71_v27, %v55_v11 }
  0x32   :  { %v88_v36 = vadd.f32 %v72_v28, %v56_v16  ;;  %v89_v37 = vadd.f32 %v73_v29, %v57_v18  ;;  %v99_v38 = vld [vmem:[#allocation2 + $0x22] sm:$0x1]  ;;  %v100_v39 = vld [vmem:[#allocation2 + $0x26] sm:$0x1]  ;;  %v212_v40 = vsel %vm211_vm4, %v210_v13, %v209_v33  ;;  %v90_v41 = vadd.f32 %v74_v34, %v58_v19  ;;  %v101_v42 = vld [vmem:[#allocation2 + $0x2a] sm:$0x1] }
  0x33   :  { %v102_v43 = vld [vmem:[#allocation2 + $0x2e] sm:$0x1]  ;;  %v103_v44 = vld [vmem:[#allocation2 + $0x32] sm:$0x1]  ;;  %v115_v45 = vadd.f32 %v99_v38, %v83_v25  ;;  %v116_v46 = vadd.f32 %v100_v39, %v84_v30  ;;  %v215_v47 = vsel %vm214_vm5, %v213_v14, %v212_v40  ;;  %v104_v48 = vld [vmem:[#allocation2 + $0x36] sm:$0x1]  ;;  %v117_v51 = vadd.f32 %v101_v42, %v85_v31 }
  0x34   :  { %v105_v49 = vld [vmem:[#allocation2 + $0x3a] sm:$0x1]  ;;  %v106_v50 = vld [vmem:[#allocation2 + $0x3e] sm:$0x1]  ;;  %v118_v52 = vadd.f32 %v102_v43, %v86_v32  ;;  %v119_v53 = vadd.f32 %v103_v44, %v87_v35  ;;  %v218_v54 = vsel %vm217_vm6, %v216_v15, %v215_v47  ;;  %v120_v55 = vadd.f32 %v104_v48, %v88_v36  ;;  %v131_v58 = vld [vmem:[#allocation2 + $0x23] sm:$0x1] }
  0x35   :  { %v121_v56 = vadd.f32 %v105_v49, %v89_v37  ;;  %v122_v57 = vadd.f32 %v106_v50, %v90_v41  ;;  %v132_v59 = vld [vmem:[#allocation2 + $0x27] sm:$0x1]  ;;  %v133_v60 = vld [vmem:[#allocation2 + $0x2b] sm:$0x1]  ;;  %350 = vmatprep.mubr.msk.f32.mxu0 %vm233_vm7, %v218_v54  ;;  %v134_v61 = vld [vmem:[#allocation2 + $0x2f] sm:$0x1]  ;;  %v147_v0 = vadd.f32 %v131_v58, %v115_v45 }
  0x36   :  { %v135_v62 = vld [vmem:[#allocation2 + $0x33] sm:$0x1]  ;;  %v136_v63 = vld [vmem:[#allocation2 + $0x37] sm:$0x1]  ;;  %v148_v1 = vadd.f32 %v132_v59, %v116_v46  ;;  %v149_v2 = vadd.f32 %v133_v60, %v117_v51  ;;  %v137_v3 = vld [vmem:[#allocation2 + $0x3b] sm:$0x1]  ;;  %v150_v5 = vadd.f32 %v134_v61, %v118_v52 }
  0x37   :  { %v138_v4 = vld [vmem:[#allocation2 + $0x3f] sm:$0x1]  ;;  %v151_v6 = vadd.f32 %v135_v62, %v119_v53  ;;  %v152_v7 = vadd.f32 %v136_v63, %v120_v55  ;;  %v153_v8 = vadd.f32 %v137_v3, %v121_v56  ;;  %v163_v10 = vmul.f32 0.25, %v147_v0  ;;  %v333_v32 = vld [vmem:[%s489_s2] ss:$0 sm:$0xff]  ;;  %s320_s27 = sshll.u32 %s432_s26, 4  ;;  %s321_s27 = int_to_ptr.vmem [resolvable:$true] %s320_s27 }
  0x38   :  { %v154_v9 = vadd.f32 %v138_v4, %v122_v57  ;;  %v164_v11 = vmul.f32 0.25, %v148_v1  ;;  %v165_v12 = vmul.f32 0.25, %v149_v2  ;;  %v166_v13 = vmul.f32 0.25, %v150_v5  ;;  %s400_s28 = scalar_lea.vmem %s321_s27, 256  ;;  %p405_p11 = scmp.lt.s32.totalorder %s321_s27, %s321_s27 }
  0x39   :  { %v167_v14 = vmul.f32 0.25, %v151_v6  ;;  %v168_v15 = vmul.f32 0.25, %v152_v7  ;;  %v169_v16 = vmul.f32 0.25, %v153_v8  ;;  %p401_p10 = scmp.ne.s32.totalorder %s321_s27, %s400_s28  ;;  %p406_p12 = scmp.lt.s32.totalorder %s400_s28, %s400_s28 }
  0x3a   :  { %v170_v17 = vmul.f32 0.25, %v154_v9  ;;  %v219_v18 = vrot.slane %v164_v11, 7  ;;  %v221_v19 = vrot.slane %v165_v12, 6  ;;  %v223_v20 = vrot.slane %v166_v13, 5 }
  0x3b   :  { %v225_v21 = vrot.slane %v167_v14, 4  ;;  %v227_v23 = vrot.slane %v168_v15, 3  ;;  %v229_v25 = vrot.slane %v169_v16, 2  ;;  %p407_p13 = por %p406_p12, %p405_p11 }
  0x3c   :  { %v220_v22 = vsel %vm199_vm0, %v219_v18, %v163_v10  ;;  %v231_v27 = vrot.slane %v170_v17, 1 }
  0x3d   :  { %v222_v24 = vsel %vm202_vm1, %v221_v19, %v220_v22  ;;  %p408_p0 = pnand %p407_p13, %p401_p10 }
  0x3e   :  { %v224_v26 = vsel %vm205_vm2, %v223_v20, %v222_v24 }
  0x3f   :  { %v226_v28 = vsel %vm208_vm3, %v225_v21, %v224_v26 }
  0x40   :  { %v228_v29 = vsel %vm211_vm4, %v227_v23, %v226_v28 }
  0x41   :  { %v230_v30 = vsel %vm214_vm5, %v229_v25, %v228_v29 }
  0x42   :  { %v232_v31 = vsel %vm217_vm6, %v231_v27, %v230_v30 }
  0x43   :  { %351 = vmatmul.mubr.msk.f32.vlgmr.msra.gmra.mxu0 %vm233_vm7, %v232_v31 }
 0x103   :  { %v352_v33 = vpop.f32.mrf.mxu0 }
 0x104   :  { %v310_v34 = vadd.f32 %v352_v33, %v333_v32 }
 0x105   :  { %v304_v35 = vpop.f32.mrf.mxu0 }
 0x106   :  { %314 = vst [vmem:[#allocation7 + $0x8] sm:$0xff] %v310_v34  ;;  %v305_v36 = vadd.f32 %v333_v32, %v304_v35 }
 0x108   :  { %313 = vst [vmem:[#allocation7] sm:$0xff] %v305_v36 }
 0x109   :  { %411 = shalt.err (!%p408_p0)
}
 0x10a   :  { %326 = dma.vmem_to_hbm [thread:$0]  %s321_s27, 256, %s490_s3, [#allocation4], %s430_s22, %s430_s22, %s431_s23  }
 0x10b   :  { %424 = dma.done.wait [#allocation4], 256  }
 0x10c   :  { %425 = vsyncadd [#allocation4], 4294967040 }
 0x10d   :  { %330 = vsyncpa [#allocation3], 1 }
 0x10e   :  { %331 = vsyncpa [#allocation6], 1 }
 0x10f   :  { %332 = vsyncpa [#allocation4], 1 }

</bundles_post_ra>
